<compile_context>
chip_gen: v7x
topology: tpu7x:2x2x1
jax: 0.10.0
libtpu: 0.0.40
codegen_flags: <defaults>
</compile_context>

<pallas_src>
import math

import jax
import jax.numpy as jnp
from jax import lax
from jax.experimental import pallas as pl
from jax.experimental.pallas import tpu as pltpu


def _round_up(x, m):
    return ((x + m - 1) // m) * m


def _vmem_capacity_bytes():
    # 75%-of-capacity cap is applied by the caller; fall back to the smallest
    # per-TensorCore VMEM across generations (v7x: 64 MiB) if the query fails.
    try:
        return int(pltpu.get_tpu_info().vmem_capacity_bytes)
    except Exception:
        return 64 << 20


def _dot_nt(x, w):
    # (tm, tk) x (tn, tk) -> (tm, tn): contract the last dim of BOTH operands,
    # keeping the weight in its native (out, in) layout so no wrapper-side
    # transpose HBM pass is needed; the MXU handles the transposed operand.
    return lax.dot_general(
        x,
        w,
        dimension_numbers=(((1,), (1,)), ((), ())),
        preferred_element_type=jnp.float32,
    )


def _kernel_single_k(x_ref, w_ref, b_ref, o_ref):
    # K fits in one tile: write the output directly (no accumulator scratch,
    # no zero-init, no extra (tm, tn) f32 VMEM round trip).
    acc = _dot_nt(x_ref[...], w_ref[...])
    o_ref[...] = (acc + b_ref[...].astype(jnp.float32)).astype(o_ref.dtype)


def _kernel_multi_k(x_ref, w_ref, b_ref, o_ref, acc_ref):
    # x_ref: (tm, tk), w_ref: (tn, tk), b_ref: (1, tn), o_ref: (tm, tn)
    # acc_ref: (tm, tn) f32 scratch, persists across the K grid axis.
    k = pl.program_id(2)

    @pl.when(k == 0)
    def _():
        acc_ref[...] = jnp.zeros_like(acc_ref)

    acc_ref[...] += _dot_nt(x_ref[...], w_ref[...])

    @pl.when(k == pl.num_programs(2) - 1)
    def _():
        o_ref[...] = (acc_ref[...] + b_ref[...].astype(jnp.float32)).astype(
            o_ref.dtype
        )


def meta_linear(x, weight, bias, *, tm=512, tn=512, tk=1024, compute_dtype=None):
    """Pallas implementation of F.linear(x, weight, bias).

    x:      (..., in_features)
    weight: (out_features, in_features)   (native PyTorch nn.Linear layout)
    bias:   (out_features,)
    compute_dtype: optionally cast x / weight (e.g. jnp.bfloat16) to feed the
        MXU at its native width; accumulation stays f32. Default: no cast.
    """
    orig_lead = x.shape[:-1]
    K = x.shape[-1]
    N, K2 = weight.shape
    assert K == K2, "in_features mismatch"

    out_dtype = x.dtype
    if compute_dtype is not None:
        x = x.astype(compute_dtype)
        weight = weight.astype(compute_dtype)

    x2 = x.reshape(-1, K)
    M = x2.shape[0]
    in_dtype = x2.dtype
    itemsize = jnp.dtype(in_dtype).itemsize
    sublane = {4: 8, 2: 16, 1: 32}.get(itemsize, 8)

    # Sanitize user tile hints to hardware alignment.
    tm = _round_up(max(tm, 1), sublane)
    tn = _round_up(max(tn, 1), 128)
    tk = _round_up(max(tk, 1), 128)

    # Tile choice: use the full dimension when it fits in a single (large)
    # default tile -- "block == full array dim" is always legal, so small
    # layers need zero padding.  Otherwise use the aligned default tile and
    # zero-pad up to a multiple of it (zeros are neutral for the matmul).
    def pick(dim, default):
        if dim <= default:
            return dim, dim
        return default, _round_up(dim, default)

    tm_, Mp = pick(M, tm)
    tn_, Np = pick(N, tn)
    tk_, Kp = pick(K, tk)

    x_p = x2 if (Mp, Kp) == (M, K) else jnp.pad(x2, ((0, Mp - M), (0, Kp - K)))
    w_p = (
        weight
        if (Np, Kp) == (N, K)
        else jnp.pad(weight, ((0, Np - N), (0, Kp - K)))
    )
    b_p = bias if Np == N else jnp.pad(bias, (0, Np - N))
    b2 = b_p.reshape(1, Np)

    n_grid, m_grid, k_grid = Np // tn_, Mp // tm_, Kp // tk_

    # VMEM budget: double-buffered input/output tiles + single f32 accumulator,
    # plus headroom for compiler-internal scratch, capped at 75% of physical
    # per-core VMEM (64 MiB on v7x, 128 MiB on v5e/v6e).
    acc_bytes = tm_ * tn_ * 4 if k_grid > 1 else 0
    tile_bytes = 2 * (tm_ * tk_ + tn_ * tk_ + tm_ * tn_ + tn_) * itemsize
    capacity = _vmem_capacity_bytes()
    vmem_limit = min(int(tile_bytes + acc_bytes + (4 << 20)), int(0.75 * capacity))
    vmem_limit = max(vmem_limit, 8 << 20)

    # Advisory cost hint; accounts for operand re-reads across the grid.
    w_reads = m_grid if k_grid > 1 else 1
    cost = pl.CostEstimate(
        flops=2 * Mp * Np * Kp,
        transcendentals=0,
        bytes_accessed=(Mp * Kp * n_grid + Np * Kp * w_reads + Np + Mp * Np)
        * itemsize,
    )

    if k_grid == 1:
        # Fast path: whole K in one tile; 2-D (parallel, parallel) grid, and the
        # weight block (n, 0) is reused across consecutive M steps without
        # re-DMA.
        out = pl.pallas_call(
            _kernel_single_k,
            out_shape=jax.ShapeDtypeStruct((Mp, Np), out_dtype),
            grid_spec=pltpu.PrefetchScalarGridSpec(
                num_scalar_prefetch=0,
                grid=(n_grid, m_grid),
                in_specs=[
                    pl.BlockSpec((tm_, tk_), lambda n, m: (m, 0)),  # x tile
                    pl.BlockSpec((tn_, tk_), lambda n, m: (n, 0)),  # W tile (native)
                    pl.BlockSpec((1, tn_), lambda n, m: (0, n)),    # bias tile
                ],
                out_specs=pl.BlockSpec((tm_, tn_), lambda n, m: (m, n)),
            ),
            compiler_params=pltpu.CompilerParams(
                dimension_semantics=("parallel", "parallel"),
                vmem_limit_bytes=vmem_limit,
            ),
            cost_estimate=cost,
        )(x_p, w_p, b2)
    else:
        out = pl.pallas_call(
            _kernel_multi_k,
            out_shape=jax.ShapeDtypeStruct((Mp, Np), out_dtype),
            grid_spec=pltpu.PrefetchScalarGridSpec(
                num_scalar_prefetch=0,
                grid=(n_grid, m_grid, k_grid),
                in_specs=[
                    pl.BlockSpec((tm_, tk_), lambda n, m, k: (m, k)),  # x tile
                    pl.BlockSpec((tn_, tk_), lambda n, m, k: (n, k)),  # W tile (native)
                    pl.BlockSpec((1, tn_), lambda n, m, k: (0, n)),    # bias tile
                ],
                out_specs=pl.BlockSpec((tm_, tn_), lambda n, m, k: (m, n)),
                scratch_shapes=[pltpu.VMEM((tm_, tn_), jnp.float32)],
            ),
            compiler_params=pltpu.CompilerParams(
                dimension_semantics=("parallel", "parallel", "arbitrary"),
                vmem_limit_bytes=vmem_limit,
            ),
            cost_estimate=cost,
        )(x_p, w_p, b2)

    if (Mp, Np) != (M, N):
        # TODO(synk): replace pad+slice on ragged M/N with masked stores to
        # avoid the extra HBM pass on very large unaligned shapes.
        out = out[:M, :N]
    return out.reshape(*orig_lead, N)


def init_meta_linear_params(key, in_features, out_features, dtype=jnp.float32):
    """Deterministic nn.Linear-style init: U(-1/sqrt(in), 1/sqrt(in))."""
    kw, kb = jax.random.split(key)
    bound = 1.0 / math.sqrt(in_features)
    weight = jax.random.uniform(
        kw, (out_features, in_features), dtype=dtype, minval=-bound, maxval=bound
    )
    bias = jax.random.uniform(
        kb, (out_features,), dtype=dtype, minval=-bound, maxval=bound
    )
    return weight, bias


if __name__ == "__main__":
    key = jax.random.PRNGKey(0)
    kx, kp, kx2, kp2 = jax.random.split(key, 4)

    # Small shapes matching the module's typical use (MetaLinear in an MLP).
    batch, in_features, out_features = 8, 32, 64
    x = jax.random.normal(kx, (batch, in_features), dtype=jnp.float32)
    weight, bias = init_meta_linear_params(kp, in_features, out_features)

    y = jax.block_until_ready(meta_linear(x, weight, bias))
    y_ref = x @ weight.T + bias
    assert y.shape == (batch, out_features)
    assert jnp.allclose(y, y_ref, atol=2e-5, rtol=2e-5), "mismatch vs reference"

    # Exercise the multi-K accumulator path + ragged padding with tiny tiles.
    M2, K2_, N2 = 16, 256, 192
    x_b = jax.random.normal(kx2, (M2, K2_), dtype=jnp.float32)
    w_b, b_b = init_meta_linear_params(kp2, K2_, N2)
    y_b = jax.block_until_ready(meta_linear(x_b, w_b, b_b, tm=8, tn=128, tk=128))
    y_b_ref = x_b @ w_b.T + b_b
    assert y_b.shape == (M2, N2)
    assert jnp.allclose(y_b, y_b_ref, atol=1e-4, rtol=1e-4), "mismatch (multi-K)"

    print("KERNEL_OK")
</pallas_src>

<mosaic_0001>
module attributes {stable_mosaic.version = 11 : i64} {
  func.func @_kernel_single_k(%arg0: i32, %arg1: i32, %arg2: memref<8x32xf32, #tpu.memory_space<vmem>>, %arg3: memref<64x32xf32, #tpu.memory_space<vmem>>, %arg4: memref<1x64xf32, #tpu.memory_space<vmem>>, %arg5: memref<8x64xf32, #tpu.memory_space<vmem>>) attributes {dimension_semantics = [#tpu.dimension_semantics<parallel>, #tpu.dimension_semantics<parallel>], iteration_bounds = array<i64: 1, 1>, scalar_prefetch = 0 : i64, scratch_operands = 0 : i64, tpu.core_type = #tpu.core_type<tc>, window_params = [{transform_indices = @transform_0, window_bounds = array<i64: 8, 32>}, {transform_indices = @transform_1, window_bounds = array<i64: 64, 32>}, {transform_indices = @transform_2, window_bounds = array<i64: 1, 64>}, {transform_indices = @transform_3, window_bounds = array<i64: 8, 64>}]} {
    %c0 = arith.constant 0 : index
    %c0_0 = arith.constant 0 : index
    %0 = vector.load %arg2[%c0, %c0_0] : memref<8x32xf32, #tpu.memory_space<vmem>>, vector<8x32xf32>
    %c0_1 = arith.constant 0 : index
    %c0_2 = arith.constant 0 : index
    %1 = vector.load %arg3[%c0_1, %c0_2] : memref<64x32xf32, #tpu.memory_space<vmem>>, vector<64x32xf32>
    %cst = arith.constant dense<0.000000e+00> : vector<8x64xf32>
    %2 = tpu.matmul %0, %1, %cst {dimension_numbers = #tpu.dot_dimension_numbers<[1], [1], [0], [0], [0, 0, 1, 0], [], []>} : vector<8x32xf32>, vector<64x32xf32>, vector<8x64xf32> -> vector<8x64xf32>
    %c0_3 = arith.constant 0 : index
    %c0_4 = arith.constant 0 : index
    %3 = vector.load %arg4[%c0_3, %c0_4] : memref<1x64xf32, #tpu.memory_space<vmem>>, vector<1x64xf32>
    %4 = vector.broadcast %3 : vector<1x64xf32> to vector<8x64xf32>
    %5 = arith.addf %2, %4 : vector<8x64xf32>
    %c0_5 = arith.constant 0 : index
    %c0_6 = arith.constant 0 : index
    %6 = vector.load %arg5[%c0_5, %c0_6] : memref<8x64xf32, #tpu.memory_space<vmem>>, vector<8x64xf32>
    tpu.vector_store %arg5[%c0_5, %c0_6], %5 {strides = array<i32>} : memref<8x64xf32, #tpu.memory_space<vmem>>, vector<8x64xf32>,
    return
  }
  func.func @transform_0(%arg0: i32, %arg1: i32) -> (i32, i32) {
    %c0_i32 = arith.constant 0 : i32
    %c0_i32_0 = arith.constant 0 : i32
    return %arg1, %c0_i32 : i32, i32
  }
  func.func @transform_1(%arg0: i32, %arg1: i32) -> (i32, i32) {
    %c0_i32 = arith.constant 0 : i32
    %c0_i32_0 = arith.constant 0 : i32
    return %arg0, %c0_i32 : i32, i32
  }
  func.func @transform_2(%arg0: i32, %arg1: i32) -> (i32, i32) {
    %c0_i32 = arith.constant 0 : i32
    %c0_i32_0 = arith.constant 0 : i32
    return %c0_i32, %arg0 : i32, i32
  }
  func.func @transform_3(%arg0: i32, %arg1: i32) -> (i32, i32) {
    %c0_i32 = arith.constant 0 : i32
    return %arg1, %arg0 : i32, i32
  }
}

</mosaic_0001>

<bundles_post_ra>
// kernel: tpu_custom_call.1
= control target key start
LH: loop header
LB: loop body
LE: loop exit
PB: predicated region body
PF: predicated region fallthrough
CT: control target
= control target key end

     0   :  { %vm31_vm0 = vcmask 261120   ;;  %v227_v2 = vmov 0.0|0.0   ;;  %vm228_vm2 = vmmov 0   ;;  %v229_v5 = vmov 0.0   ;;  %s308_s0 = inlined_call_operand.vmem [shape: f32[8,32], index: 0, kind: input, shape index: {}]   ;;  %s309_s1 = inlined_call_operand.vmem [shape: f32[64,32], index: 1, kind: input, shape index: {}]   ;;  %s310_s2 = inlined_call_operand.vmem [shape: f32[1,64], index: 2, kind: input, shape index: {}]   ;;  %s311_s3 = inlined_call_operand.hbm [shape: f32[8,64], index: 3, kind: output, shape index: {}]  }
   0x1   :  { %v16_v0 = vld [vmem:[%s309_s1] sm:$0xff]  ;;  %v17_v1 = vld [vmem:[%s309_s1 + $0x8] sm:$0xff]  ;;  %183 = vmatprep.subr.bf16.mxu0 %v227_v2  ;;  %vm259_vm1 = vmpackc.low %vm31_vm0, %vm31_vm0  ;;  %180 = vmatprep.mubr.msk.f32.mxu0 %vm228_vm2, %v229_v5 }
   0x2   :  { %v184_v3 = vpack.c.bf16 %v17_v1, %v16_v0 }
   0x4   :  { %186 = vmatpush3.bf16.xpose.msk.msra.mxu0 %vm259_vm1, %v184_v3 }
   0x5   :  { %8 = vsyncpa [#allocation3], 0  ;;  %187 = vmatprep.subr.bf16.mxu0 %v227_v2  ;;  %v18_v6 = vld [vmem:[%s309_s1 + $0x10] sm:$0xff]  ;;  %v19_v7 = vld [vmem:[%s309_s1 + $0x18] sm:$0xff]  ;;  %s230_s5 = smov [#allocation2]   ;;  %vm129_vm3 = vcmask 523264  }
   0x6   :  { %v188_v8 = vpack.c.bf16 %v19_v7, %v18_v6  ;;  %v20_v9 = vld [vmem:[%s309_s1 + $0x20] sm:$0xff]  ;;  %v21_v10 = vld [vmem:[%s309_s1 + $0x28] sm:$0xff]  ;;  %v22_v12 = vld [vmem:[%s309_s1 + $0x30] sm:$0xff]  ;;  %s137_s6 = sshll.u32 %s230_s5, 4  ;;  %s138_s6 = int_to_ptr.vmem [resolvable:$true] %s137_s6 }
   0x7   :  { %v192_v11 = vpack.c.bf16 %v21_v10, %v20_v9  ;;  %v23_v13 = vld [vmem:[%s309_s1 + $0x38] sm:$0xff]  ;;  %v15_v15 = vld [vmem:[%s308_s0] sm:$0xff]  ;;  %s203_s1 = scalar_lea.vmem %s138_s6, 128  ;;  %p208_p1 = scmp.lt.s32.totalorder %s138_s6, %s138_s6 }
   0x8   :  { %v196_v14 = vpack.c.bf16 %v23_v13, %v22_v12  ;;  %v145_v16 = vld [vmem:[%s310_s2] ss:$0 sm:$0xff]  ;;  %p204_p0 = scmp.ne.s32.totalorder %s138_s6, %s203_s1  ;;  %p209_p2 = scmp.lt.s32.totalorder %s203_s1, %s203_s1 }
   0xa   :  { %p210_p3 = por %p209_p2, %p208_p1 }
   0xc   :  { %190 = vmatpush3.bf16.xpose.msk.msra.mxu0 %vm259_vm1, %v188_v8  ;;  %p211_p4 = pnand %p210_p3, %p204_p0 }
   0xd   :  { %191 = vmatprep.subr.bf16.mxu0 %v227_v2 }
  0x14   :  { %194 = vmatpush3.bf16.xpose.msk.msra.mxu0 %vm259_vm1, %v192_v11 }
  0x15   :  { %195 = vmatprep.subr.bf16.mxu0 %v227_v2 }
  0x1c   :  { %198 = vmatpush3.bf16.xpose.msk.msra.mxu0 %vm259_vm1, %v196_v14 }
  0x23   :  { %181 = vmatmul.mubr.msk.f32.vlgmr.msra.gmra.mrb[0].mxu0 %vm31_vm0, %v15_v15 }
  0xf6   :  { %v125_v17 = vpop.f32.mrb[0].mxu0 }
  0xf7   :  { %v126_v18 = vadd.f32 %v145_v16, %v125_v17  ;;  %v182_v19 = vpop.f32.mrb[1].mxu0 }
  0xf9   :  { %130 = vst.msk [vmem:[#allocation2] sm:$0xff] %vm129_vm3, %v126_v18 }
  0xfa   :  { %214 = shalt.err (!%p211_p4)
}
  0xfb   :  { %s215_s8 = scalar_lea.hbm %s311_s3, 128 }
  0xfc   :  { %p216_p5 = scmp.ne.s32.totalorder %s311_s3, %s215_s8  ;;  %p219_p6 = scmp.lt.u32.totalorder %s215_s8, %s311_s3 }
  0xfe   :  { %p221_p7 = pnand %p219_p6, %p216_p5 }
 0x100   :  { %224 = shalt.err (!%p221_p7)
}
 0x101   :  { %140 = dma.vmem_to_hbm [thread:$0]  %s138_s6, 128, %s311_s3, [#allocation3]  }
 0x102   :  { %225 = dma.done.wait [#allocation3], 128  }
 0x103   :  { %226 = vsyncadd [#allocation3], 4294967168 }
 0x104   :  { %144 = vsyncpa [#allocation3], 1 }

</bundles_post_ra>
